<compile_context>
chip_gen: v5e
topology: v5e:2x2
jax: 0.10.0
libtpu: 0.0.40
codegen_flags: <defaults>
</compile_context>

<pallas_src>
import jax
import jax.numpy as jnp
from jax.experimental import pallas as pl
from jax.experimental.pallas import tpu as pltpu

D_IN = 10       # input features (dominant HBM stream; kept unpadded)
H = 32          # true hidden size
H_PAD = 128     # hidden padded to one full lane group
OUT_PAD = 128   # lane-dense output width (real output is column 0)
TB_MAX = 1024   # batch tile (rows)


def _round_up(n, m):
    return (n + m - 1) // m * m


def mlp_kernel(x_ref, w1_ref, b1_ref, w2_ref, b2_ref, o_ref):
    # x:(TB, D_IN)  w1:(D_IN, H_PAD)  b1:(1, H_PAD)  w2:(H_PAD, OUT_PAD)  b2:(1, OUT_PAD)
    x = x_ref[...]
    # Layer 1: Linear + ReLU (MXU matmul + VPU max). Padded hidden columns stay 0.
    h = jnp.dot(x, w1_ref[...], preferred_element_type=jnp.float32) + b1_ref[...]
    h = jnp.maximum(h, 0.0)
    # Layer 2: Linear + Sigmoid (MXU matmul + EUP exp). Single lane-dense store.
    z = jnp.dot(h, w2_ref[...], preferred_element_type=jnp.float32) + b2_ref[...]
    o_ref[...] = jax.nn.sigmoid(z)


@jax.jit
def mlp_forward(x, w1, b1, w2, b2):
    """x:(B, D_IN); w1:(D_IN, H); b1:(H,); w2:(H, 1); b2:(1,). Returns (B, 1)."""
    B = x.shape[0]

    # Zero-pad the tiny params so the hidden and output dims are full 128-lane
    # slabs (one-time cost, negligible; padded hidden -> h cols = relu(0)=0 and
    # padded w2 rows are 0, so the real output column is unchanged).
    w1p = jnp.zeros((D_IN, H_PAD), jnp.float32).at[:, :H].set(w1)
    b1p = jnp.zeros((1, H_PAD), jnp.float32).at[0, :H].set(b1)
    w2p = jnp.zeros((H_PAD, OUT_PAD), jnp.float32).at[:H, :1].set(w2)
    b2p = jnp.zeros((1, OUT_PAD), jnp.float32).at[0, :1].set(b2)

    # Batch tiling: big row tile, pad B so the tile divides it evenly.
    TB = min(TB_MAX, _round_up(B, 8))
    B_pad = _round_up(B, TB)
    if B_pad != B:
        x = jnp.pad(x, ((0, B_pad - B), (0, 0)))

    grid = (B_pad // TB,)
    flops = 2 * B_pad * (D_IN * H_PAD + H_PAD * OUT_PAD)
    bytes_accessed = 4 * (B_pad * D_IN + B_pad * OUT_PAD
                          + D_IN * H_PAD + H_PAD + H_PAD * OUT_PAD + OUT_PAD)

    out = pl.pallas_call(
        mlp_kernel,
        out_shape=jax.ShapeDtypeStruct((B_pad, OUT_PAD), jnp.float32),
        grid_spec=pltpu.PrefetchScalarGridSpec(
            num_scalar_prefetch=0,
            grid=grid,
            in_specs=[
                pl.BlockSpec((TB, D_IN), lambda i: (i, 0)),        # streamed x, double-buffered
                pl.BlockSpec((D_IN, H_PAD), lambda i: (0, 0)),     # resident weights
                pl.BlockSpec((1, H_PAD), lambda i: (0, 0)),
                pl.BlockSpec((H_PAD, OUT_PAD), lambda i: (0, 0)),
                pl.BlockSpec((1, OUT_PAD), lambda i: (0, 0)),
            ],
            out_specs=pl.BlockSpec((TB, OUT_PAD), lambda i: (i, 0)),
        ),
        compiler_params=pltpu.CompilerParams(
            dimension_semantics=("parallel",),   # megacore split of the batch on v7x
        ),
        cost_estimate=pl.CostEstimate(
            flops=flops, transcendentals=B_pad, bytes_accessed=bytes_accessed),
    )(x, w1p, b1p, w2p, b2p)

    # Column 0 is the real output; padded columns hold sigmoid(0)=0.5 and any
    # padded batch rows are dummies. Slice both away.
    return out[:B, :1]


def init_params(key, input_size=10, hidden=32):
    # Deterministic init mimicking PyTorch's default uniform(-1/sqrt(fan_in), 1/sqrt(fan_in)).
    k1, k2, k3, k4 = jax.random.split(key, 4)
    bound1 = 1.0 / jnp.sqrt(input_size)
    bound2 = 1.0 / jnp.sqrt(hidden)
    # Stored already transposed: (in, out)
    w1 = jax.random.uniform(k1, (input_size, hidden), jnp.float32, -bound1, bound1)
    b1 = jax.random.uniform(k2, (hidden,), jnp.float32, -bound1, bound1)
    w2 = jax.random.uniform(k3, (hidden, 1), jnp.float32, -bound2, bound2)
    b2 = jax.random.uniform(k4, (1,), jnp.float32, -bound2, bound2)
    return w1, b1, w2, b2


def _ref(x, w1, b1, w2, b2):
    return jax.nn.sigmoid(jnp.maximum(x @ w1 + b1[None, :], 0.0) @ w2 + b2[None, :])


if __name__ == "__main__":
    key = jax.random.PRNGKey(0)
    kx, kp, kx2 = jax.random.split(key, 3)

    batch, input_size, hidden = 8, 10, 32
    w1, b1, w2, b2 = init_params(kp, input_size, hidden)

    # Small-shape check (single tile).
    x = jax.random.normal(kx, (batch, input_size), jnp.float32)
    out = mlp_forward(x, w1, b1, w2, b2)
    jax.block_until_ready(out)
    assert out.shape == (batch, 1)
    assert jnp.allclose(out, _ref(x, w1, b1, w2, b2), atol=1e-5), "mismatch vs reference"

    # Larger, non-multiple-of-TB batch to exercise the tiled/padded path.
    x2 = jax.random.normal(kx2, (2500, input_size), jnp.float32)
    out2 = mlp_forward(x2, w1, b1, w2, b2)
    jax.block_until_ready(out2)
    assert out2.shape == (2500, 1)
    assert jnp.allclose(out2, _ref(x2, w1, b1, w2, b2), atol=1e-5), "mismatch vs reference (tiled)"

    print("KERNEL_OK")
</pallas_src>

<mosaic_0001>
module attributes {stable_mosaic.version = 11 : i64} {
  func.func @mlp_kernel(%arg0: i32, %arg1: memref<8x10xf32, #tpu.memory_space<vmem>>, %arg2: memref<10x128xf32, #tpu.memory_space<vmem>>, %arg3: memref<1x128xf32, #tpu.memory_space<vmem>>, %arg4: memref<128x128xf32, #tpu.memory_space<vmem>>, %arg5: memref<1x128xf32, #tpu.memory_space<vmem>>, %arg6: memref<8x128xf32, #tpu.memory_space<vmem>>) attributes {dimension_semantics = [#tpu.dimension_semantics<parallel>], iteration_bounds = array<i64: 1>, scalar_prefetch = 0 : i64, scratch_operands = 0 : i64, tpu.core_type = #tpu.core_type<tc>, window_params = [{transform_indices = @transform_0, window_bounds = array<i64: 8, 10>}, {pipeline_mode = #tpu.pipeline_mode<synchronous>, transform_indices = @transform_1, window_bounds = array<i64: 10, 128>}, {pipeline_mode = #tpu.pipeline_mode<synchronous>, transform_indices = @transform_2, window_bounds = array<i64: 1, 128>}, {pipeline_mode = #tpu.pipeline_mode<synchronous>, transform_indices = @transform_3, window_bounds = array<i64: 128, 128>}, {pipeline_mode = #tpu.pipeline_mode<synchronous>, transform_indices = @transform_4, window_bounds = array<i64: 1, 128>}, {transform_indices = @transform_5, window_bounds = array<i64: 8, 128>}]} {
    %c0 = arith.constant 0 : index
    %c0_0 = arith.constant 0 : index
    %0 = vector.load %arg1[%c0, %c0_0] : memref<8x10xf32, #tpu.memory_space<vmem>>, vector<8x10xf32>
    %c0_1 = arith.constant 0 : index
    %c0_2 = arith.constant 0 : index
    %1 = vector.load %arg2[%c0_1, %c0_2] : memref<10x128xf32, #tpu.memory_space<vmem>>, vector<10x128xf32>
    %cst = arith.constant dense<0.000000e+00> : vector<8x128xf32>
    %2 = tpu.matmul %0, %1, %cst {dimension_numbers = #tpu.dot_dimension_numbers<[1], [0], [0], [1], [0, 0, 1, 1], [], []>} : vector<8x10xf32>, vector<10x128xf32>, vector<8x128xf32> -> vector<8x128xf32>
    %c0_3 = arith.constant 0 : index
    %c0_4 = arith.constant 0 : index
    %3 = vector.load %arg3[%c0_3, %c0_4] : memref<1x128xf32, #tpu.memory_space<vmem>>, vector<1x128xf32>
    %4 = vector.broadcast %3 : vector<1x128xf32> to vector<8x128xf32>
    %5 = arith.addf %2, %4 : vector<8x128xf32>
    %cst_5 = arith.constant 0.000000e+00 : f32
    %6 = vector.broadcast %cst_5 : f32 to vector<8x128xf32>
    %7 = arith.maximumf %5, %6 : vector<8x128xf32>
    %c0_6 = arith.constant 0 : index
    %c0_7 = arith.constant 0 : index
    %8 = vector.load %arg4[%c0_6, %c0_7] : memref<128x128xf32, #tpu.memory_space<vmem>>, vector<128x128xf32>
    %cst_8 = arith.constant dense<0.000000e+00> : vector<8x128xf32>
    %9 = tpu.matmul %7, %8, %cst_8 {dimension_numbers = #tpu.dot_dimension_numbers<[1], [0], [0], [1], [0, 0, 1, 1], [], []>} : vector<8x128xf32>, vector<128x128xf32>, vector<8x128xf32> -> vector<8x128xf32>
    %c0_9 = arith.constant 0 : index
    %c0_10 = arith.constant 0 : index
    %10 = vector.load %arg5[%c0_9, %c0_10] : memref<1x128xf32, #tpu.memory_space<vmem>>, vector<1x128xf32>
    %11 = vector.broadcast %10 : vector<1x128xf32> to vector<8x128xf32>
    %12 = arith.addf %9, %11 : vector<8x128xf32>
    %13 = arith.negf %12 : vector<8x128xf32>
    %14 = math.exp %13 : vector<8x128xf32>
    %cst_11 = arith.constant 1.000000e+00 : f32
    %15 = vector.broadcast %cst_11 : f32 to vector<8x128xf32>
    %16 = arith.addf %15, %14 : vector<8x128xf32>
    %17 = arith.divf %15, %16 : vector<8x128xf32>
    %c0_12 = arith.constant 0 : index
    %c0_13 = arith.constant 0 : index
    %18 = vector.load %arg6[%c0_12, %c0_13] : memref<8x128xf32, #tpu.memory_space<vmem>>, vector<8x128xf32>
    tpu.vector_store %arg6[%c0_12, %c0_13], %17 {strides = array<i32>} : memref<8x128xf32, #tpu.memory_space<vmem>>, vector<8x128xf32>,
    return
  }
  func.func @transform_0(%arg0: i32) -> (i32, i32) {
    %c0_i32 = arith.constant 0 : i32
    %c0_i32_0 = arith.constant 0 : i32
    return %arg0, %c0_i32 : i32, i32
  }
  func.func @transform_1(%arg0: i32) -> (i32, i32) {
    %c0_i32 = arith.constant 0 : i32
    %c0_i32_0 = arith.constant 0 : i32
    %c0_i32_1 = arith.constant 0 : i32
    return %c0_i32, %c0_i32_0 : i32, i32
  }
  func.func @transform_2(%arg0: i32) -> (i32, i32) {
    %c0_i32 = arith.constant 0 : i32
    %c0_i32_0 = arith.constant 0 : i32
    %c0_i32_1 = arith.constant 0 : i32
    return %c0_i32, %c0_i32_0 : i32, i32
  }
  func.func @transform_3(%arg0: i32) -> (i32, i32) {
    %c0_i32 = arith.constant 0 : i32
    %c0_i32_0 = arith.constant 0 : i32
    %c0_i32_1 = arith.constant 0 : i32
    return %c0_i32, %c0_i32_0 : i32, i32
  }
  func.func @transform_4(%arg0: i32) -> (i32, i32) {
    %c0_i32 = arith.constant 0 : i32
    %c0_i32_0 = arith.constant 0 : i32
    %c0_i32_1 = arith.constant 0 : i32
    return %c0_i32, %c0_i32_0 : i32, i32
  }
  func.func @transform_5(%arg0: i32) -> (i32, i32) {
    %c0_i32 = arith.constant 0 : i32
    %c0_i32_0 = arith.constant 0 : i32
    return %arg0, %c0_i32 : i32, i32
  }
}

</mosaic_0001>

<bundles_post_ra>
// kernel: mlp_forward.1
= control target key start
LH: loop header
LB: loop body
LE: loop exit
PB: predicated region body
PF: predicated region fallthrough
CT: control target
= control target key end

     0   :  { %vm31_vm0 = vcmask 1041408   ;;  %vm27_vm1 = vcmask 80896   ;;  %s225_s1 = inlined_call_operand.vmem [shape: f32[10,128], index: 1, kind: input, shape index: {}]   ;;  %s226_s0 = inlined_call_operand.vmem [shape: f32[8,10], index: 0, kind: input, shape index: {}]   ;;  %s227_s3 = inlined_call_operand.vmem [shape: f32[128,128], index: 3, kind: input, shape index: {}]   ;;  %s228_s2 = inlined_call_operand.vmem [shape: f32[1,128], index: 2, kind: input, shape index: {}]   ;;  %s229_s4 = inlined_call_operand.vmem [shape: f32[1,128], index: 4, kind: input, shape index: {}]   ;;  %s230_s5 = inlined_call_operand.vmem [shape: f32[8,128], index: 5, kind: output, shape index: {}]  }
   0x1   :  { %v22_v0 = vld [vmem:[%s225_s1 + $0x8] sm:$0x3]  ;;  %v21_v1 = vld [vmem:[%s225_s1] sm:$0xff]  ;;  %v71_v3 = vld [vmem:[%s227_s3 + $0x78] sm:$0xff] }
   0x2   :  { %120 = vmatpush.msk.msra.mxu0 %vm31_vm0, %v22_v0  ;;  %v20_v2 = vld [vmem:[%s226_s0] sm:$0xff]  ;;  %v70_v4 = vld [vmem:[%s227_s3 + $0x70] sm:$0xff]  ;;  %76 = vmatpush.msra.mxu1 %v71_v3  ;;  %v69_v5 = vld [vmem:[%s227_s3 + $0x68] sm:$0xff] }
   0x3   :  { %v68_v6 = vld [vmem:[%s227_s3 + $0x60] sm:$0xff]  ;;  %v67_v7 = vld [vmem:[%s227_s3 + $0x58] sm:$0xff]  ;;  %v66_v8 = vld [vmem:[%s227_s3 + $0x50] sm:$0xff] }
   0x4   :  { %50 = vmatpush.msra.mxu0 %v21_v1  ;;  %77 = vmatpush.msra.mxu1 %v70_v4  ;;  %v65_v9 = vld [vmem:[%s227_s3 + $0x48] sm:$0xff]  ;;  %v64_v10 = vld [vmem:[%s227_s3 + $0x40] sm:$0xff]  ;;  %v63_v11 = vld [vmem:[%s227_s3 + $0x38] sm:$0xff] }
   0x5   :  { %121 = vmatmul.msk.f32.vlgmr.msra.gmra.mxu0 %vm27_vm1, %v20_v2  ;;  %v62_v12 = vld [vmem:[%s227_s3 + $0x30] sm:$0xff]  ;;  %v61_v13 = vld [vmem:[%s227_s3 + $0x28] sm:$0xff]  ;;  %v60_v14 = vld [vmem:[%s227_s3 + $0x20] sm:$0xff] }
   0x6   :  { %78 = vmatpush.msra.mxu1 %v69_v5  ;;  %v59_v15 = vld [vmem:[%s227_s3 + $0x18] sm:$0xff]  ;;  %v58_v16 = vld [vmem:[%s227_s3 + $0x10] sm:$0xff]  ;;  %v57_v17 = vld [vmem:[%s227_s3 + $0x8] sm:$0xff] }
   0x7   :  { %v56_v18 = vld [vmem:[%s227_s3] sm:$0xff] }
   0x8   :  { %79 = vmatpush.msra.mxu1 %v68_v6  ;;  %v123_v19 = vld [vmem:[%s228_s2] ss:$0 sm:$0xff] }
   0x9   :  { %v124_v23 = vld [vmem:[%s229_s4] ss:$0 sm:$0xff] }
   0xa   :  { %80 = vmatpush.msra.mxu1 %v67_v7 }
   0xc   :  { %81 = vmatpush.msra.mxu1 %v66_v8 }
   0xe   :  { %82 = vmatpush.msra.mxu1 %v65_v9 }
  0x10   :  { %83 = vmatpush.msra.mxu1 %v64_v10 }
  0x12   :  { %84 = vmatpush.msra.mxu1 %v63_v11 }
  0x14   :  { %85 = vmatpush.msra.mxu1 %v62_v12 }
  0x16   :  { %86 = vmatpush.msra.mxu1 %v61_v13 }
  0x18   :  { %87 = vmatpush.msra.mxu1 %v60_v14 }
  0x1a   :  { %88 = vmatpush.msra.mxu1 %v59_v15 }
  0x1c   :  { %89 = vmatpush.msra.mxu1 %v58_v16 }
  0x1e   :  { %90 = vmatpush.msra.mxu1 %v57_v17 }
  0x20   :  { %91 = vmatpush.msra.mxu1 %v56_v18 }
  0x82   :  { %v52_v20 = vpop.f32.mrf.mxu0 }
  0x83   :  { %v53_v21 = vadd.f32 %v123_v19, %v52_v20 }
  0x85   :  { %v55_v22 = vmax.f32 %v53_v21, 0.0 }
  0x87   :  { %92 = vmatmul.f32.vlgmr.msra.gmra.mxu1 %v55_v22 }
 0x104   :  { %v93_v24 = vpop.f32.mrf.mxu1 }
 0x105   :  { %v94_v25 = vadd.f32 %v124_v23, %v93_v24 }
 0x107   :  { %v122_v26 = vmul.f32 -1.442695, %v94_v25 }
 0x109   :  { %125 = vpow2.f32 %v122_v26 }
 0x10f   :  { %v126_v27 = vpop.eup %125 }
 0x110   :  { %v99_v28 = vadd.f32 1.0, %v126_v27 }
 0x112   :  { %127 = vrcp.f32 %v99_v28  ;;  %v111_v32 = vand.u32 2147483648, %v99_v28  ;;  %v109_v34 = vand.u32 2147483647, %v99_v28  ;;  %vm105_vm3 = vweird.f32 %v99_v28 }
 0x114   :  { %v112_v36 = vor.u32 1.1754944e-38, %v111_v32  ;;  %vm110_vm5 = vcmp.eq.f32.partialorder %v109_v34, 8.507059e+37 }
 0x118   :  { %v128_v29 = vpop.eup %127 }
 0x119   :  { %v101_v30 = vmul.f32 %v128_v29, %v99_v28  ;;  %vm106_vm2 = vweird.f32 %v128_v29 }
 0x11a   :  { %vm107_vm4 = vmor %vm105_vm3, %vm106_vm2 }
 0x11b   :  { %v102_v31 = vsub.f32 1.0, %v101_v30 }
 0x11d   :  { %v103_v33 = vmul.f32 %v128_v29, %v102_v31 }
 0x11f   :  { %v104_v35 = vadd.f32 %v128_v29, %v103_v33 }
 0x121   :  { %v108_v37 = vsel %vm107_vm4, %v128_v29, %v104_v35 }
 0x122   :  { %v113_v38 = vsel %vm110_vm5, %v112_v36, %v108_v37 }
 0x123   :  { %115 = vst [vmem:[%s230_s5] sm:$0xff] %v113_v38 }

</bundles_post_ra>
